<compile_context>
chip_gen: v7x
topology: tpu7x:2x2x1
jax: 0.10.0
libtpu: 0.0.40
codegen_flags: <defaults>
</compile_context>

<pallas_src>
import functools

import numpy as np

import jax
import jax.numpy as jnp
from jax import lax
from jax.experimental import pallas as pl
from jax.experimental.pallas import tpu as pltpu


# ---------------------------------------------------------------------------
# Kernel
# ---------------------------------------------------------------------------
def _basic_block_kernel(x_ref, b1_ref, bias1_ref, b2_ref, bias2_ref, out_ref,
                        *, hh):
    # x_ref    : (Mb, L)  f32   Nc images stacked along M (Mb = Nc*hh super rows)
    # b*_ref   : (3, L, L) bf16 banded conv(+BN scale) weights, one per row band
    # bias*_ref: (1, L)   f32   folded BN bias, tiled over lanes
    # out_ref  : (Mb, L)  f32
    mb = x_ref.shape[0]
    x = x_ref[...]                                    # f32; also the residual

    # Per-image vertical boundary masks (built once, shared by both convs).
    row = lax.broadcasted_iota(jnp.int32, x.shape, 0)
    top = (row % hh) == 0              # first super row of each image
    bot = (row % hh) == (hh - 1)       # last  super row of each image

    def conv_bn(inp, bmat_ref, bias_ref):
        # Shifted operands in registers: roll on the XLU, boundary zeroing on
        # the VPU -- no VMEM halo scratch, no misaligned sublane reloads.
        up = jnp.where(top, 0.0, pltpu.roll(inp, shift=1, axis=0))       # row above
        dn = jnp.where(bot, 0.0, pltpu.roll(inp, shift=mb - 1, axis=0))  # row below
        # bf16 MXU operands, f32 accumulation (acc += chain accumulates in the
        # MRB on v7x / sequential result pops on v5e/v6e).
        acc = jnp.dot(up.astype(jnp.bfloat16), bmat_ref[0],
                      preferred_element_type=jnp.float32)
        acc += jnp.dot(inp.astype(jnp.bfloat16), bmat_ref[1],
                       preferred_element_type=jnp.float32)
        acc += jnp.dot(dn.astype(jnp.bfloat16), bmat_ref[2],
                       preferred_element_type=jnp.float32)
        # TODO(synk): optionally merge the 3 band matmuls into one K=3L
        # contraction once the lane-concat cost is measured to be hidden.
        return acc + bias_ref[...]                    # (Mb, L) + (1, L), f32

    h1 = jnp.maximum(conv_bn(x, b1_ref, bias1_ref), 0.0)   # stays in vregs/VMEM
    out = conv_bn(h1, b2_ref, bias2_ref) + x                 # residual add, f32
    out_ref[...] = jnp.maximum(out, 0.0).astype(out_ref.dtype)


# ---------------------------------------------------------------------------
# Parameter preparation (one-time, wrapper side)
# ---------------------------------------------------------------------------
def _choose_fold(H, W, C):
    """Smallest row-fold so that fold*W*C is a multiple of 128 (lane width)."""
    for f in (1, 2, 4, 8, 16, 32):
        if H % f == 0 and (f * W * C) % 128 == 0:
            return f
    # TODO(synk): pad C to the next multiple making fold*W*C % 128 == 0 and
    # slice on output, instead of failing.
    raise ValueError(
        f"no row-fold makes fold*W*C lane-dense (H={H}, W={W}, C={C})")


def _make_selector(W, fold):
    """0/1 tensor sel[t, kh, kw, a, b]: output lane-group b=(i, wo) of a super
    row takes input lane-group a=(j, wi) of the super row shifted by t-1,
    through conv tap (kh, kw).  Encodes dy/dx shifts + W-edge zero padding."""
    Lw = fold * W
    sel = np.zeros((3, 3, 3, Lw, Lw), np.float32)
    for t in range(3):
        dys = t - 1
        for kh in range(3):
            for i in range(fold):
                j = i + kh - 1 - fold * dys          # source row inside band
                if not (0 <= j < fold):
                    continue
                for kw in range(3):
                    for wo in range(W):
                        wi = wo + kw - 1
                        if 0 <= wi < W:              # W-edge padding -> skip
                            sel[t, kh, kw, j * W + wi, i * W + wo] = 1.0
    return sel


def _fold_bn(gamma, beta, mean, var, eps=1e-5):
    scale = gamma / jnp.sqrt(var + eps)
    bias = beta - mean * scale
    return scale, bias


def _banded_weights(w_oihw, scale, W, fold):
    """(Cout, Cin, 3, 3) conv weight + BN scale -> (3, fold*W*Cin, fold*W*Cout)
    banded matrices, emitted in bf16 for native MXU operands."""
    w_hwio = jnp.transpose(w_oihw, (2, 3, 1, 0)) * scale[None, None, None, :]
    sel = jnp.asarray(_make_selector(W, fold))           # (3,3,3,Lw,Lw)
    b = jnp.einsum("thkab,hkio->taibo", sel, w_hwio)     # (3,Lw,Cin,Lw,Cout)
    Cout, Cin = w_oihw.shape[0], w_oihw.shape[1]
    return b.reshape(3, fold * W * Cin, fold * W * Cout).astype(jnp.bfloat16)


# ---------------------------------------------------------------------------
# Forward wrappers
# ---------------------------------------------------------------------------
def basic_block_forward_nhwc(x_nhwc, params, eps=1e-5):
    """BasicBlock.forward (stride=1, dilation=1, downsample=None) on NHWC input.
    Preferred entry point: no activation-layout transposes are paid."""
    N, H, W, C = x_nhwc.shape
    fold = _choose_fold(H, W, C)
    Hh, L = H // fold, fold * W * C

    # 2-way batch split -> one grid step per TensorCore on v7x (megacore); each
    # step stacks Nc images into the matmul M dimension.
    G = 2 if (N % 2 == 0 and ((N // 2) * Hh) % 8 == 0) else 1
    Nc = N // G
    Mb = Nc * Hh

    s1, b1 = _fold_bn(params["gamma1"], params["beta1"],
                      params["mean1"], params["var1"], eps)
    s2, b2 = _fold_bn(params["gamma2"], params["beta2"],
                      params["mean2"], params["var2"], eps)

    w1b = _banded_weights(params["w1"], s1, W, fold)      # (3, L, L) bf16
    w2b = _banded_weights(params["w2"], s2, W, fold)      # (3, L, L) bf16
    bias1 = jnp.tile(b1, fold * W).reshape(1, L)          # (1, L) f32
    bias2 = jnp.tile(b2, fold * W).reshape(1, L)

    # Lane-dense activation layout: (N, H, W, C) -> (N*Hh, L) is a free reshape.
    xs = x_nhwc.astype(jnp.float32).reshape(N * Hh, L)

    # True 3x3-conv FLOPs for the two convs (not the dense banded count).
    flops = 2 * (2 * 9 * C * C * N * H * W)
    bytes_accessed = (4 * 2 * N * H * W * C          # activation in + out (f32)
                      + 2 * 2 * 3 * L * L            # banded weights (bf16)
                      + 4 * 2 * L)                   # biases (f32)

    out = pl.pallas_call(
        functools.partial(_basic_block_kernel, hh=Hh),
        out_shape=jax.ShapeDtypeStruct((N * Hh, L), jnp.float32),
        grid_spec=pltpu.PrefetchScalarGridSpec(
            num_scalar_prefetch=0,
            grid=(G,),
            in_specs=[
                pl.BlockSpec((Mb, L), lambda g: (g, 0)),
                # Constant-index weight blocks (resident across the grid).
                pl.BlockSpec((3, L, L), lambda g: (0, 0, 0)),
                pl.BlockSpec((1, L), lambda g: (0, 0)),
                pl.BlockSpec((3, L, L), lambda g: (0, 0, 0)),
                pl.BlockSpec((1, L), lambda g: (0, 0)),
            ],
            out_specs=pl.BlockSpec((Mb, L), lambda g: (g, 0)),
        ),
        compiler_params=pltpu.CompilerParams(
            dimension_semantics=("parallel",)),
        cost_estimate=pl.CostEstimate(flops=flops, transcendentals=0,
                                      bytes_accessed=bytes_accessed),
    )(xs, w1b, bias1, w2b, bias2)

    return out.reshape(N, H, W, C)


def basic_block_forward(x_nchw, params, eps=1e-5):
    """PyTorch-layout (NCHW) compatibility wrapper.  Use the NHWC entry point
    across a whole network so the layout transposes are not paid per block."""
    out = basic_block_forward_nhwc(
        jnp.transpose(x_nchw, (0, 2, 3, 1)), params, eps)
    return jnp.transpose(out, (0, 3, 1, 2))


# ---------------------------------------------------------------------------
# Pure-JAX reference for correctness check
# ---------------------------------------------------------------------------
def _reference_forward(x_nchw, params, eps=1e-5):
    def conv(x, w_oihw):
        return lax.conv_general_dilated(
            x, w_oihw, window_strides=(1, 1), padding=((1, 1), (1, 1)),
            dimension_numbers=("NCHW", "OIHW", "NCHW"))

    def bn(x, g, b, m, v):
        g, b, m, v = (a[None, :, None, None] for a in (g, b, m, v))
        return (x - m) / jnp.sqrt(v + eps) * g + b

    out = jax.nn.relu(bn(conv(x_nchw, params["w1"]), params["gamma1"],
                         params["beta1"], params["mean1"], params["var1"]))
    out = bn(conv(out, params["w2"]), params["gamma2"], params["beta2"],
             params["mean2"], params["var2"])
    return jax.nn.relu(out + x_nchw)


if __name__ == "__main__":
    # BasicBlock(inplanes=4, planes=4, stride=1, dilation=1, downsample=None)
    N, C, H, W = 2, 4, 16, 16
    keys = jax.random.split(jax.random.PRNGKey(0), 11)

    params = {
        "w1": 0.1 * jax.random.normal(keys[0], (C, C, 3, 3), jnp.float32),
        "w2": 0.1 * jax.random.normal(keys[1], (C, C, 3, 3), jnp.float32),
        "gamma1": 1.0 + 0.1 * jax.random.normal(keys[2], (C,), jnp.float32),
        "beta1": 0.1 * jax.random.normal(keys[3], (C,), jnp.float32),
        "mean1": 0.1 * jax.random.normal(keys[4], (C,), jnp.float32),
        "var1": 1.0 + 0.1 * jax.random.uniform(keys[5], (C,), jnp.float32),
        "gamma2": 1.0 + 0.1 * jax.random.normal(keys[6], (C,), jnp.float32),
        "beta2": 0.1 * jax.random.normal(keys[7], (C,), jnp.float32),
        "mean2": 0.1 * jax.random.normal(keys[8], (C,), jnp.float32),
        "var2": 1.0 + 0.1 * jax.random.uniform(keys[9], (C,), jnp.float32),
    }
    x = jax.random.normal(keys[10], (N, C, H, W), jnp.float32)

    out = jax.block_until_ready(basic_block_forward(x, params))
    ref = jax.block_until_ready(_reference_forward(x, params))

    assert out.shape == (N, C, H, W)
    max_err = float(jnp.max(jnp.abs(out - ref)))
    # Tolerance sized for bf16 MXU operands with f32 accumulation / epilogue
    # (reference conv runs in full f32).
    assert jnp.allclose(out, ref, atol=2e-2, rtol=2e-2), (
        f"mismatch vs reference, max abs err {max_err}")

    print("KERNEL_OK")
</pallas_src>

<mosaic_0001>
module attributes {stable_mosaic.version = 11 : i64} {
  func.func @_basic_block_kernel(%arg0: i32, %arg1: memref<8x128xf32, #tpu.memory_space<vmem>>, %arg2: memref<3x128x128xbf16, #tpu.memory_space<vmem>>, %arg3: memref<1x128xf32, #tpu.memory_space<vmem>>, %arg4: memref<3x128x128xbf16, #tpu.memory_space<vmem>>, %arg5: memref<1x128xf32, #tpu.memory_space<vmem>>, %arg6: memref<8x128xf32, #tpu.memory_space<vmem>>) attributes {dimension_semantics = [#tpu.dimension_semantics<parallel>], iteration_bounds = array<i64: 2>, scalar_prefetch = 0 : i64, scratch_operands = 0 : i64, tpu.core_type = #tpu.core_type<tc>, window_params = [{transform_indices = @transform_0, window_bounds = array<i64: 8, 128>}, {pipeline_mode = #tpu.pipeline_mode<synchronous>, transform_indices = @transform_1, window_bounds = array<i64: 3, 128, 128>}, {pipeline_mode = #tpu.pipeline_mode<synchronous>, transform_indices = @transform_2, window_bounds = array<i64: 1, 128>}, {pipeline_mode = #tpu.pipeline_mode<synchronous>, transform_indices = @transform_3, window_bounds = array<i64: 3, 128, 128>}, {pipeline_mode = #tpu.pipeline_mode<synchronous>, transform_indices = @transform_4, window_bounds = array<i64: 1, 128>}, {transform_indices = @transform_5, window_bounds = array<i64: 8, 128>}]} {
    %c0 = arith.constant 0 : index
    %c0_0 = arith.constant 0 : index
    %0 = vector.load %arg1[%c0, %c0_0] : memref<8x128xf32, #tpu.memory_space<vmem>>, vector<8x128xf32>
    %1 = tpu.iota {dimensions = array<i32: 0>} : vector<8x128xi32>
    %c8_i32 = arith.constant 8 : i32
    %c0_i32 = arith.constant 0 : i32
    %2 = arith.cmpi eq, %c8_i32, %c0_i32 : i32
    %c1_i32 = arith.constant 1 : i32
    %3 = arith.select %2, %c1_i32, %c8_i32 : i32
    %4 = vector.broadcast %3 : i32 to vector<8x128xi32>
    %5 = arith.remsi %1, %4 : vector<8x128xi32>
    %c0_i32_1 = arith.constant 0 : i32
    %6 = vector.broadcast %c0_i32_1 : i32 to vector<8x128xi32>
    %7 = arith.cmpi ne, %5, %6 : vector<8x128xi32>
    %c0_i32_2 = arith.constant 0 : i32
    %8 = vector.broadcast %c0_i32_2 : i32 to vector<8x128xi32>
    %9 = arith.cmpi slt, %5, %8 : vector<8x128xi32>
    %c0_i32_3 = arith.constant 0 : i32
    %10 = arith.cmpi slt, %3, %c0_i32_3 : i32
    %11 = vector.broadcast %10 : i1 to vector<8x128xi1>
    %12 = vector.broadcast %11 : vector<8x128xi1> to vector<8x128xi1>
    %13 = arith.xori %9, %12 : vector<8x128xi1>
    %14 = arith.andi %13, %7 : vector<8x128xi1>
    %15 = vector.broadcast %3 : i32 to vector<8x128xi32>
    %16 = arith.addi %5, %15 : vector<8x128xi32>
    %17 = arith.select %14, %16, %5 : vector<8x128xi1>, vector<8x128xi32>
    %c0_i32_4 = arith.constant 0 : i32
    %18 = vector.broadcast %c0_i32_4 : i32 to vector<8x128xi32>
    %19 = arith.cmpi eq, %17, %18 : vector<8x128xi32>
    %c8_i32_5 = arith.constant 8 : i32
    %c0_i32_6 = arith.constant 0 : i32
    %20 = arith.cmpi eq, %c8_i32_5, %c0_i32_6 : i32
    %c1_i32_7 = arith.constant 1 : i32
    %21 = arith.select %20, %c1_i32_7, %c8_i32_5 : i32
    %22 = vector.broadcast %21 : i32 to vector<8x128xi32>
    %23 = arith.remsi %1, %22 : vector<8x128xi32>
    %c0_i32_8 = arith.constant 0 : i32
    %24 = vector.broadcast %c0_i32_8 : i32 to vector<8x128xi32>
    %25 = arith.cmpi ne, %23, %24 : vector<8x128xi32>
    %c0_i32_9 = arith.constant 0 : i32
    %26 = vector.broadcast %c0_i32_9 : i32 to vector<8x128xi32>
    %27 = arith.cmpi slt, %23, %26 : vector<8x128xi32>
    %c0_i32_10 = arith.constant 0 : i32
    %28 = arith.cmpi slt, %21, %c0_i32_10 : i32
    %29 = vector.broadcast %28 : i1 to vector<8x128xi1>
    %30 = vector.broadcast %29 : vector<8x128xi1> to vector<8x128xi1>
    %31 = arith.xori %27, %30 : vector<8x128xi1>
    %32 = arith.andi %31, %25 : vector<8x128xi1>
    %33 = vector.broadcast %21 : i32 to vector<8x128xi32>
    %34 = arith.addi %23, %33 : vector<8x128xi32>
    %35 = arith.select %32, %34, %23 : vector<8x128xi1>, vector<8x128xi32>
    %c7_i32 = arith.constant 7 : i32
    %36 = vector.broadcast %c7_i32 : i32 to vector<8x128xi32>
    %37 = arith.cmpi eq, %35, %36 : vector<8x128xi32>
    %c1_i32_11 = arith.constant 1 : i32
    %38 = tpu.dynamic_rotate %0 by %c1_i32_11 dim 0 : vector<8x128xf32>, i32 -> vector<8x128xf32>
    %cst = arith.constant 0.000000e+00 : f32
    %39 = vector.broadcast %cst : f32 to vector<8x128xf32>
    %40 = arith.select %19, %39, %38 : vector<8x128xi1>, vector<8x128xf32>
    %c7_i32_12 = arith.constant 7 : i32
    %41 = tpu.dynamic_rotate %0 by %c7_i32_12 dim 0 : vector<8x128xf32>, i32 -> vector<8x128xf32>
    %cst_13 = arith.constant 0.000000e+00 : f32
    %42 = vector.broadcast %cst_13 : f32 to vector<8x128xf32>
    %43 = arith.select %37, %42, %41 : vector<8x128xi1>, vector<8x128xf32>
    %44 = arith.truncf %40 : vector<8x128xf32> to vector<8x128xbf16>
    %c0_14 = arith.constant 0 : index
    %c0_15 = arith.constant 0 : index
    %c0_16 = arith.constant 0 : index
    %45 = vector.load %arg2[%c0_14, %c0_15, %c0_16] : memref<3x128x128xbf16, #tpu.memory_space<vmem>>, vector<1x128x128xbf16>
    %46 = vector.shape_cast %45 : vector<1x128x128xbf16> to vector<128x128xbf16>
    %cst_17 = arith.constant dense<0.000000e+00> : vector<8x128xf32>
    %47 = tpu.matmul %44, %46, %cst_17 {dimension_numbers = #tpu.dot_dimension_numbers<[1], [0], [0], [1], [0, 0, 1, 1], [], []>} : vector<8x128xbf16>, vector<128x128xbf16>, vector<8x128xf32> -> vector<8x128xf32>
    %48 = arith.truncf %0 : vector<8x128xf32> to vector<8x128xbf16>
    %c1 = arith.constant 1 : index
    %c0_18 = arith.constant 0 : index
    %c0_19 = arith.constant 0 : index
    %49 = vector.load %arg2[%c1, %c0_18, %c0_19] : memref<3x128x128xbf16, #tpu.memory_space<vmem>>, vector<1x128x128xbf16>
    %50 = vector.shape_cast %49 : vector<1x128x128xbf16> to vector<128x128xbf16>
    %cst_20 = arith.constant dense<0.000000e+00> : vector<8x128xf32>
    %51 = tpu.matmul %48, %50, %cst_20 {dimension_numbers = #tpu.dot_dimension_numbers<[1], [0], [0], [1], [0, 0, 1, 1], [], []>} : vector<8x128xbf16>, vector<128x128xbf16>, vector<8x128xf32> -> vector<8x128xf32>
    %52 = arith.addf %47, %51 : vector<8x128xf32>
    %53 = arith.truncf %43 : vector<8x128xf32> to vector<8x128xbf16>
    %c2 = arith.constant 2 : index
    %c0_21 = arith.constant 0 : index
    %c0_22 = arith.constant 0 : index
    %54 = vector.load %arg2[%c2, %c0_21, %c0_22] : memref<3x128x128xbf16, #tpu.memory_space<vmem>>, vector<1x128x128xbf16>
    %55 = vector.shape_cast %54 : vector<1x128x128xbf16> to vector<128x128xbf16>
    %cst_23 = arith.constant dense<0.000000e+00> : vector<8x128xf32>
    %56 = tpu.matmul %53, %55, %cst_23 {dimension_numbers = #tpu.dot_dimension_numbers<[1], [0], [0], [1], [0, 0, 1, 1], [], []>} : vector<8x128xbf16>, vector<128x128xbf16>, vector<8x128xf32> -> vector<8x128xf32>
    %57 = arith.addf %52, %56 : vector<8x128xf32>
    %c0_24 = arith.constant 0 : index
    %c0_25 = arith.constant 0 : index
    %58 = vector.load %arg3[%c0_24, %c0_25] : memref<1x128xf32, #tpu.memory_space<vmem>>, vector<1x128xf32>
    %59 = vector.broadcast %58 : vector<1x128xf32> to vector<8x128xf32>
    %60 = arith.addf %57, %59 : vector<8x128xf32>
    %cst_26 = arith.constant 0.000000e+00 : f32
    %61 = vector.broadcast %cst_26 : f32 to vector<8x128xf32>
    %62 = arith.maximumf %60, %61 : vector<8x128xf32>
    %c1_i32_27 = arith.constant 1 : i32
    %63 = tpu.dynamic_rotate %62 by %c1_i32_27 dim 0 : vector<8x128xf32>, i32 -> vector<8x128xf32>
    %cst_28 = arith.constant 0.000000e+00 : f32
    %64 = vector.broadcast %cst_28 : f32 to vector<8x128xf32>
    %65 = arith.select %19, %64, %63 : vector<8x128xi1>, vector<8x128xf32>
    %c7_i32_29 = arith.constant 7 : i32
    %66 = tpu.dynamic_rotate %62 by %c7_i32_29 dim 0 : vector<8x128xf32>, i32 -> vector<8x128xf32>
    %cst_30 = arith.constant 0.000000e+00 : f32
    %67 = vector.broadcast %cst_30 : f32 to vector<8x128xf32>
    %68 = arith.select %37, %67, %66 : vector<8x128xi1>, vector<8x128xf32>
    %69 = arith.truncf %65 : vector<8x128xf32> to vector<8x128xbf16>
    %c0_31 = arith.constant 0 : index
    %c0_32 = arith.constant 0 : index
    %c0_33 = arith.constant 0 : index
    %70 = vector.load %arg4[%c0_31, %c0_32, %c0_33] : memref<3x128x128xbf16, #tpu.memory_space<vmem>>, vector<1x128x128xbf16>
    %71 = vector.shape_cast %70 : vector<1x128x128xbf16> to vector<128x128xbf16>
    %cst_34 = arith.constant dense<0.000000e+00> : vector<8x128xf32>
    %72 = tpu.matmul %69, %71, %cst_34 {dimension_numbers = #tpu.dot_dimension_numbers<[1], [0], [0], [1], [0, 0, 1, 1], [], []>} : vector<8x128xbf16>, vector<128x128xbf16>, vector<8x128xf32> -> vector<8x128xf32>
    %73 = arith.truncf %62 : vector<8x128xf32> to vector<8x128xbf16>
    %c1_35 = arith.constant 1 : index
    %c0_36 = arith.constant 0 : index
    %c0_37 = arith.constant 0 : index
    %74 = vector.load %arg4[%c1_35, %c0_36, %c0_37] : memref<3x128x128xbf16, #tpu.memory_space<vmem>>, vector<1x128x128xbf16>
    %75 = vector.shape_cast %74 : vector<1x128x128xbf16> to vector<128x128xbf16>
    %cst_38 = arith.constant dense<0.000000e+00> : vector<8x128xf32>
    %76 = tpu.matmul %73, %75, %cst_38 {dimension_numbers = #tpu.dot_dimension_numbers<[1], [0], [0], [1], [0, 0, 1, 1], [], []>} : vector<8x128xbf16>, vector<128x128xbf16>, vector<8x128xf32> -> vector<8x128xf32>
    %77 = arith.addf %72, %76 : vector<8x128xf32>
    %78 = arith.truncf %68 : vector<8x128xf32> to vector<8x128xbf16>
    %c2_39 = arith.constant 2 : index
    %c0_40 = arith.constant 0 : index
    %c0_41 = arith.constant 0 : index
    %79 = vector.load %arg4[%c2_39, %c0_40, %c0_41] : memref<3x128x128xbf16, #tpu.memory_space<vmem>>, vector<1x128x128xbf16>
    %80 = vector.shape_cast %79 : vector<1x128x128xbf16> to vector<128x128xbf16>
    %cst_42 = arith.constant dense<0.000000e+00> : vector<8x128xf32>
    %81 = tpu.matmul %78, %80, %cst_42 {dimension_numbers = #tpu.dot_dimension_numbers<[1], [0], [0], [1], [0, 0, 1, 1], [], []>} : vector<8x128xbf16>, vector<128x128xbf16>, vector<8x128xf32> -> vector<8x128xf32>
    %82 = arith.addf %77, %81 : vector<8x128xf32>
    %c0_43 = arith.constant 0 : index
    %c0_44 = arith.constant 0 : index
    %83 = vector.load %arg5[%c0_43, %c0_44] : memref<1x128xf32, #tpu.memory_space<vmem>>, vector<1x128xf32>
    %84 = vector.broadcast %83 : vector<1x128xf32> to vector<8x128xf32>
    %85 = arith.addf %82, %84 : vector<8x128xf32>
    %86 = arith.addf %85, %0 : vector<8x128xf32>
    %cst_45 = arith.constant 0.000000e+00 : f32
    %87 = vector.broadcast %cst_45 : f32 to vector<8x128xf32>
    %88 = arith.maximumf %86, %87 : vector<8x128xf32>
    %c0_46 = arith.constant 0 : index
    %c0_47 = arith.constant 0 : index
    %89 = vector.load %arg6[%c0_46, %c0_47] : memref<8x128xf32, #tpu.memory_space<vmem>>, vector<8x128xf32>
    tpu.vector_store %arg6[%c0_46, %c0_47], %88 {strides = array<i32>} : memref<8x128xf32, #tpu.memory_space<vmem>>, vector<8x128xf32>,
    return
  }
  func.func @transform_0(%arg0: i32) -> (i32, i32) {
    %c0_i32 = arith.constant 0 : i32
    %c0_i32_0 = arith.constant 0 : i32
    return %arg0, %c0_i32 : i32, i32
  }
  func.func @transform_1(%arg0: i32) -> (i32, i32, i32) {
    %c0_i32 = arith.constant 0 : i32
    %c0_i32_0 = arith.constant 0 : i32
    %c0_i32_1 = arith.constant 0 : i32
    %c0_i32_2 = arith.constant 0 : i32
    return %c0_i32, %c0_i32_0, %c0_i32_1 : i32, i32, i32
  }
  func.func @transform_2(%arg0: i32) -> (i32, i32) {
    %c0_i32 = arith.constant 0 : i32
    %c0_i32_0 = arith.constant 0 : i32
    %c0_i32_1 = arith.constant 0 : i32
    return %c0_i32, %c0_i32_0 : i32, i32
  }
  func.func @transform_3(%arg0: i32) -> (i32, i32, i32) {
    %c0_i32 = arith.constant 0 : i32
    %c0_i32_0 = arith.constant 0 : i32
    %c0_i32_1 = arith.constant 0 : i32
    %c0_i32_2 = arith.constant 0 : i32
    return %c0_i32, %c0_i32_0, %c0_i32_1 : i32, i32, i32
  }
  func.func @transform_4(%arg0: i32) -> (i32, i32) {
    %c0_i32 = arith.constant 0 : i32
    %c0_i32_0 = arith.constant 0 : i32
    %c0_i32_1 = arith.constant 0 : i32
    return %c0_i32, %c0_i32_0 : i32, i32
  }
  func.func @transform_5(%arg0: i32) -> (i32, i32) {
    %c0_i32 = arith.constant 0 : i32
    %c0_i32_0 = arith.constant 0 : i32
    return %arg0, %c0_i32 : i32, i32
  }
}

</mosaic_0001>

<bundles_post_ra>
// kernel: tpu_custom_call.1
= control target key start
LH: loop header
LB: loop body
LE: loop exit
PB: predicated region body
PF: predicated region fallthrough
CT: control target
= control target key end

     0   :  { %10 = vsyncpa [#allocation3], 0  ;;  %s1977_s0 = inlined_call_operand.hbm [shape: f32[16,128], index: 0, kind: input, shape index: {}]   ;;  %s1978_s1 = inlined_call_operand.hbm [shape: bf16[3,128,128], index: 1, kind: input, shape index: {}]   ;;  %s1979_s2 = inlined_call_operand.vmem [shape: f32[1,128], index: 2, kind: input, shape index: {}]   ;;  %s1980_s3 = inlined_call_operand.hbm [shape: bf16[3,128,128], index: 3, kind: input, shape index: {}]   ;;  %s1981_s4 = inlined_call_operand.vmem [shape: f32[1,128], index: 4, kind: input, shape index: {}]   ;;  %s1982_s5 = inlined_call_operand.hbm [shape: f32[16,128], index: 5, kind: output, shape index: {}]  }
   0x1   :  { %12 = vsyncpa [#allocation3 + $0x1], 0 }
   0x2   :  { %13 = vsyncpa [#allocation6], 0 }
   0x3   :  { %14 = vsyncpa [#allocation4], 0 }
   0x4   :  { %16 = vsyncpa [#allocation4 + $0x1], 0  ;;  %s1631_s18 = smov 0   ;;  %s1633_s19 = smov 0  }
   0x5   :  { %s1635_s20 = smov 0   ;;  %s1637_s21 = smov 0  }
   0x6 LB: > { %s1652_s22 = sadd.s32 4294967295, %s1591_s21   ;;  %s1054_s23 = sadd.s32 4294967294, %s1591_s21   ;;  %s1591_s21 = sphi %s1637_s21, %s2006_s21   ;;  %s1587_s20 = sphi %s1635_s20, %s2005_s20   ;;  %s1583_s19 = sphi %s1633_s19, %s2004_s19   ;;  %s1579_s18 = sphi %s1631_s18, %s2003_s18  }
   0x7   : > { %p42_p0 = scmp.ne.s32.totalorder %s1583_s19, %s1579_s18  ;;  %p1983_p1 = scmp.eq.s32.totalorder %s1652_s22, 0 }
   0x8   : > { %p156_p3 = scmp.eq.s32.totalorder %s1054_s23, 1  ;;  %p1055_p5 = scmp.ge.s32.totalorder %s1591_s21, 1 }
   0x9   : > { %p1661_p4 = por %p1983_p1, %p42_p0  ;;  %p163_p7 = scmp.lt.s32.totalorder %s1591_s21, 3 }
   0xa   : > { %p1666_p6 = por %p156_p3, %p42_p0  ;;  %s1593_s27 = smov [#allocation5]  }
   0xb   : > { %s1986_s24 = scalar_select %p1661_p4, 1, 0 }
   0xc   : > { %s1987_s25 = scalar_select %p1666_p6, 1, 0 }
   0xd   : > { %p1671_p8 = pnand %p1055_p5, %p163_p7  ;;  %s175_s28 = sshll.u32 %s1593_s27, 4  ;;  %s1675_s28 = int_to_ptr.vmem [resolvable:$true] %s175_s28 }
   0xe   : > { %s1594_s30 = smov [#allocation7]   ;;  %s1435_s9 = scalar_lea.hbm %s1978_s1, 3072 }
   0xf   : > { %p1328_p9 = pneg %p1671_p8  ;;  %s191_s6 = sshll.u32 %s1594_s30, 4  ;;  %s1686_s6 = int_to_ptr.vmem [resolvable:$true] %s191_s6 }
  0x10   : > { %p1436_p12 = scmp.ne.s32.totalorder %s1978_s1, %s1435_s9  ;;  %p1442_p5 = scmp.lt.u32.totalorder %s1435_s9, %s1978_s1 }
  0x11   : > { %p1682_p11 = pnand %p1328_p9, %p1983_p1 }
  0x13   : > { %p1437_p13 = pneg %p1682_p11 }
  0x15   : > { %p1438_p0 = pnand %p1437_p13, %p1436_p12 }
  0x17   : > { %p1439_p3 = pneg %p1438_p0 }
  0x19   : > { %p1444_p7 = pnand %p1442_p5, %p1439_p3 }
  0x1b   : > { %1447 = shalt.err (!%p1444_p7)
}
  0x1c   : > { %s1448_s14 = scalar_lea.vmem %s1675_s28, 3072  ;;  %p1456_p2 = scmp.lt.s32.totalorder %s1675_s28, %s1675_s28 }
  0x1d   : > { %p1449_p9 = scmp.ne.s32.totalorder %s1675_s28, %s1448_s14  ;;  %p1457_p12 = scmp.lt.s32.totalorder %s1448_s14, %s1448_s14 }
  0x1f   : > { %p1451_p10 = pnand %p1449_p9, %p1437_p13  ;;  %p1458_p0 = por %p1457_p12, %p1456_p2 }
  0x21   : > { %p1452_p1 = pneg %p1451_p10 }
  0x23   : > { %p1459_p6 = pnand %p1458_p0, %p1452_p1 }
  0x25   : > { %1462 = shalt.err (!%p1459_p6)
}
  0x26   : > { %s1595_s15 = smov 64   ;;  %s1596_s16 = smov 4  }
  0x27   : > { %1331 = dma.hbm_to_vmem [thread:$0]  (!%p1682_p11), %s1978_s1, 3072, %s1675_s28, [#allocation6], %s1595_s15, %s1595_s15, %s1596_s16  }
  0x28   : > { %s1463_s7 = scalar_lea.hbm %s1980_s3, 3072 }
  0x29   : > { %p1464_p2 = scmp.ne.s32.totalorder %s1980_s3, %s1463_s7  ;;  %p1470_p10 = scmp.lt.u32.totalorder %s1463_s7, %s1980_s3 }
  0x2b   : > { %p1466_p1 = pnand %p1464_p2, %p1437_p13 }
  0x2d   : > { %p1467_p6 = pneg %p1466_p1 }
  0x2f   : > { %p1472_p3 = pnand %p1470_p10, %p1467_p6 }
  0x31   : > { %1475 = shalt.err (!%p1472_p3)
}
  0x32   : > { %s1476_s28 = scalar_lea.vmem %s1686_s6, 3072  ;;  %p1484_p12 = scmp.lt.s32.totalorder %s1686_s6, %s1686_s6 }
  0x33   : > { %p1477_p5 = scmp.ne.s32.totalorder %s1686_s6, %s1476_s28  ;;  %p1485_p0 = scmp.lt.s32.totalorder %s1476_s28, %s1476_s28 }
  0x35   : > { %p1479_p7 = pnand %p1477_p5, %p1437_p13  ;;  %p1486_p2 = por %p1485_p0, %p1484_p12 }
  0x37   : > { %p1480_p9 = pneg %p1479_p7 }
  0x39   : > { %p1487_p1 = pnand %p1486_p2, %p1480_p9 }
  0x3b   : > { %1490 = shalt.err (!%p1487_p1)
}
  0x3c   : > { %1334 = dma.hbm_to_vmem [thread:$0]  (!%p1682_p11), %s1980_s3, 3072, %s1686_s6, [#allocation6], %s1595_s15, %s1595_s15, %s1596_s16  }
  0x3d   : > { %s1741_s14 = sadd.s32 1, %s1591_s21   ;;  %s29_s29 = sadd.s32 1, %s1587_s20 }
  0x3e   : > { %s26_s17 = ssub.s32 %s1591_s21, %s1741_s14  ;;  %p36_p13 = scmp.ne.s32.totalorder %s1587_s20, %s1583_s19 }
  0x3f   : > { %p27_p6 = scmp.eq.s32.totalorder %s26_s17, 0  ;;  %p37_p10 = scmp.eq.s32.totalorder %s1591_s21, 0 }
  0x40   : > { %p1990_p3 = scmp.eq.s32.totalorder %s1652_s22, 1  ;;  %p1345_p7 = scmp.lt.s32.totalorder %s1591_s21, 2 }
  0x41   : > { %s1757_s27 = scalar_select %p27_p6, %s1587_s20, %s29_s29  }
  0x42   : > { %p1751_p5 = por %p1990_p3, %p36_p13  ;;  %p38_p9 = por %p37_p10, %p36_p13 }
  0x43   : > { %s208_s30 = sand.u32 1, %s1587_s20   ;;  %s1060_s6 = sshll.u32 %s1591_s21, 7 }
  0x44   : > { %s1991_s23 = scalar_select %p1751_p5, 1, 0 }
  0x45   : > { %s1059_s7 = sshll.u32 %s208_s30, 3  ;;  %s1764_s8 = scalar_lea.hbm %s1977_s0, %s1060_s6 }
  0x46   : > { %s212_s9 = scalar_lea.vmem [#allocation2], %s1059_s7  ;;  %p1768_p11 = pnand %p1345_p7, %p38_p9 }
  0x47   : > { %s219_s10 = sshll.u32 %s212_s9, 4  ;;  %s209_s28 = scalar_lea.sflag [#allocation3], %s208_s30  ;;  %s1766_s10 = int_to_ptr.vmem [resolvable:$true] %s219_s10 }
  0x48   : > { %s1491_s12 = scalar_lea.hbm %s1764_s8, 128  ;;  %p1493_p0 = pneg %p1768_p11 }
  0x49   : > { %p1492_p12 = scmp.ne.s32.totalorder %s1764_s8, %s1491_s12  ;;  %s1496_s17 = scalar_lea.hbm %s1977_s0, 256 }
  0x4a   : > { %p1497_p13 = scmp.lt.u32.totalorder %s1764_s8, %s1977_s0  ;;  %p1498_p6 = scmp.lt.u32.totalorder %s1496_s17, %s1491_s12 }
  0x4b   : > { %p1494_p2 = pnand %p1493_p0, %p1492_p12  ;;  %p1500_p3 = scmp.lt.u32.totalorder %s1491_s12, %s1764_s8 }
  0x4c   : > { %p1499_p10 = por %p1498_p6, %p1497_p13 }
  0x4d   : > { %p1495_p1 = pneg %p1494_p2 }
  0x4e   : > { %p1501_p7 = por %p1500_p3, %p1499_p10 }
  0x50   : > { %p1502_p9 = pnand %p1501_p7, %p1495_p1 }
  0x52   : > { %1505 = shalt.err (!%p1502_p9)
}
  0x53   : > { %s1506_s30 = scalar_lea.vmem %s1766_s10, 128  ;;  %s1597_s15 = smov [#allocation2]  }
  0x54   : > { %p1507_p12 = scmp.ne.s32.totalorder %s1766_s10, %s1506_s30  ;;  %s1511_s16 = sshll.u32 %s1597_s15, 4  ;;  %s1512_s16 = int_to_ptr.vmem [resolvable:$false] %s1511_s16 }
  0x55   : > { %s1513_s9 = scalar_lea.vmem %s1512_s16, 256  ;;  %p1514_p4 = scmp.lt.s32.totalorder %s1766_s10, %s1512_s16 }
  0x56   : > { %p1509_p2 = pnand %p1507_p12, %p1493_p0  ;;  %p1515_p13 = scmp.lt.s32.totalorder %s1513_s9, %s1506_s30 }
  0x58   : > { %p1510_p5 = pneg %p1509_p2  ;;  %p1516_p6 = por %p1515_p13, %p1514_p4 }
  0x5a   : > { %p1517_p10 = pnand %p1516_p6, %p1510_p5 }
  0x5c   : > { %1520 = shalt.err (!%p1517_p10)
}
  0x5d   : > { %1338 = dma.hbm_to_vmem [thread:$0]  (!%p1768_p11), %s1764_s8, 128, %s1766_s10, %s209_s28  }
  0x5e   : > { %228 = sbr.rel (%p1671_p8) target bundleno = 657 (0x291), region = 40  ;;  %s1800_s12 = sand.u32 (!%p1671_p8), 1, %s1583_s19  }
  0x5f   : > { %s1062_s13 = sshll.u32 (!%p1671_p8), %s1800_s12, 3  ;;  %s231_s29 = scalar_lea.sflag (!%p1671_p8), [#allocation3], %s1800_s12 }
  0x60   : > { %s1806_s17 = scalar_lea.vmem (!%p1671_p8), [#allocation2], %s1062_s13  ;;  %p1993_p4 = scmp.ne.s32.totalorder (!%p1671_p8), %s1986_s24, 0 }
  0x65   : > { %1566 = dma.done.wait (%p1993_p4), %s231_s29, 128  }
  0x66   : > { %1568 = vsyncadd (%p1993_p4), %s231_s29, 4294967168  ;;  %p1994_p5 = scmp.eq.s32.totalorder %s1652_s22, 0 }
  0x68   : > { %1570 = dma.done.wait (%p1994_p5), [#allocation6], 6144   ;;  %p1995_p8 = pmov %p1994_p5 }
  0x69   : > { %v1598_v0 = vmov 0.0   ;;  %vm1599_vm0 = vmmov 0   ;;  %v1387_v1 = vld [vmem:[#allocation5 + $0x40] sm:$0xff]   ;;  %v1389_v3 = vld [vmem:[#allocation5 + $0x48] sm:$0xff]   ;;  %v1391_v5 = vld [vmem:[#allocation5 + $0x50] sm:$0xff]   ;;  %v271_v7 = vlaneseq  ;;  %s1137_s11 = sshll.u32 %s1652_s22, 7 }
  0x6a   : > { %1572 = vsyncadd (%p1995_p8), [#allocation6], 4294961152  ;;  %1196 = vmatprep.subr.bf16.mxu0 %v1598_v0  ;;  %1216 = vmatprep.subr.bf16.mxu1 %v1598_v0  ;;  %v1388_v2 = vld [vmem:[#allocation5] sm:$0xff]   ;;  %v1390_v4 = vld [vmem:[#allocation5 + $0x8] sm:$0xff]   ;;  %s268_s28 = scalar_lea.vmem [#allocation8], %s1062_s13  ;;  %s1933_s15 = scalar_lea.hbm %s1982_s5, %s1137_s11 }
  0x6b   : > { %1212 = vmatprep.mubr.msk.bf16.mxu0 %vm1599_vm0, %v1598_v0  ;;  %1232 = vmatprep.mubr.msk.bf16.mxu1 %vm1599_vm0, %v1598_v0  ;;  %v1392_v6 = vld [vmem:[#allocation5 + $0x10] sm:$0xff]   ;;  %v1393_v8 = vld [vmem:[#allocation5 + $0x58] sm:$0xff]   ;;  %v1828_v10 = vshrl.u32 %v271_v7, 7  ;;  %v1395_v11 = vld [vmem:[#allocation5 + $0x60] sm:$0xff]   ;;  %s965_s7 = sshll.u32 %s268_s28, 4  ;;  %s952_s16 = scalar_lea.sflag [#allocation4], %s1800_s12  ;;  %s1935_s7 = int_to_ptr.vmem [resolvable:$true] %s965_s7 }
  0x6c   : > { %1197 = vmatpush3.bf16.msra.mxu0 %v1387_v1  ;;  %1217 = vmatpush3.bf16.msra.mxu1 %v1388_v2  ;;  %v1394_v9 = vld [vmem:[#allocation5 + $0x18] sm:$0xff]   ;;  %v1396_v12 = vld [vmem:[#allocation5 + $0x20] sm:$0xff]   ;;  %v1397_v13 = vld [vmem:[#allocation5 + $0x68] sm:$0xff]   ;;  %s1521_s9 = scalar_lea.vmem %s1935_s7, 128  ;;  %p2000_p0 = scmp.ne.s32.totalorder %s1991_s23, 0 }
  0x6d   : > { %1198 = vmatprep.subr.bf16.mxu0 %v1598_v0  ;;  %1218 = vmatprep.subr.bf16.mxu1 %v1598_v0  ;;  %v277_v14 = vand.u32 7, %v1828_v10  ;;  %v1398_v15 = vld [vmem:[#allocation5 + $0x28] sm:$0xff]   ;;  %v1836_v16 = vld [vmem:[%s1806_s17] sm:$0xff]  ;;  %v1403_v23 = vld [vmem:[#allocation5 + $0x80] sm:$0xff]   ;;  %p1522_p11 = scmp.ne.s32.totalorder %s1935_s7, %s1521_s9  ;;  %s1600_s22 = smov [#allocation8]  }
  0x6e   : > { %v1399_v18 = vld [vmem:[#allocation5 + $0x70] sm:$0xff]   ;;  %v1401_v20 = vld [vmem:[#allocation5 + $0x78] sm:$0xff]   ;;  %v287_v21 = vrot.slane %v1836_v16, 7  ;;  %v308_v24 = vpack.c.bf16 %v1836_v16, %v1836_v16  ;;  %v1404_v26 = vld [vmem:[#allocation5 + $0x88] sm:$0xff]   ;;  %v289_v32 = vrot.slane %v1836_v16, 1  ;;  %s1525_s13 = sshll.u32 %s1600_s22, 4  ;;  %s1526_s13 = int_to_ptr.vmem [resolvable:$false] %s1525_s13 }
  0x6f   : > { %vm1838_vm1 = vcmp.ne.s32.totalorder %v277_v14, 0  ;;  %v1400_v19 = vld [vmem:[#allocation5 + $0x30] sm:$0xff]   ;;  %v1402_v22 = vld [vmem:[#allocation5 + $0x38] sm:$0xff]   ;;  %v1407_v29 = vld [vmem:[#allocation5 + $0xa0] sm:$0xff]   ;;  %vm1871_vm3 = vcmp.ne.s32.totalorder %v277_v14, 7  ;;  %p1523_p1 = pnand %p1522_p11, %p2000_p0  ;;  %s1527_s29 = scalar_lea.vmem %s1526_s13, 256 }
  0x70   : > { %1199 = vmatpush3.bf16.msra.mxu0 %v1389_v3  ;;  %1219 = vmatpush3.bf16.msra.mxu1 %v1390_v4  ;;  %vm1084_vm2 = vmpackc.low %vm1838_vm1, %vm1838_vm1  ;;  %v1085_v25 = vpack.c.bf16 %v287_v21, %v287_v21  ;;  %v1405_v27 = vld [vmem:[#allocation5 + $0x90] sm:$0xff]   ;;  %v1406_v28 = vld [vmem:[#allocation5 + $0x98] sm:$0xff]   ;;  %v1098_v35 = vpack.c.bf16 %v289_v32, %v289_v32  ;;  %p1528_p7 = scmp.lt.s32.totalorder %s1935_s7, %s1526_s13  ;;  %p1529_p9 = scmp.lt.s32.totalorder %s1527_s29, %s1521_s9 }
  0x71   : > { %1200 = vmatprep.subr.bf16.mxu0 %v1598_v0  ;;  %1220 = vmatprep.subr.bf16.mxu1 %v1598_v0  ;;  %v1408_v30 = vld [vmem:[#allocation5 + $0xa8] sm:$0xff]   ;;  %v1409_v31 = vld [vmem:[#allocation5 + $0xb0] sm:$0xff]   ;;  %v1410_v33 = vld [vmem:[#allocation5 + $0xb8] sm:$0xff]   ;;  %p1524_p3 = pneg %p1523_p1 }
  0x72   : > { %vm1097_vm4 = vmpackc.low %vm1871_vm3, %vm1871_vm3  ;;  %v1411_v36 = vld [vmem:[#allocation7 + $0x40] sm:$0xff]   ;;  %v1413_v38 = vld [vmem:[#allocation7 + $0x48] sm:$0xff]   ;;  %p1530_p12 = por %p1529_p9, %p1528_p7 }
  0x73   : > { %v1412_v37 = vld [vmem:[#allocation7] sm:$0xff]   ;;  %v1414_v39 = vld [vmem:[#allocation7 + $0x8] sm:$0xff]   ;;  %v1415_v40 = vld [vmem:[#allocation7 + $0x50] sm:$0xff]  }
  0x74   : > { %1201 = vmatpush3.bf16.msra.mxu0 %v1391_v5  ;;  %1221 = vmatpush3.bf16.msra.mxu1 %v1392_v6  ;;  %v1416_v41 = vld [vmem:[#allocation7 + $0x10] sm:$0xff]   ;;  %v1417_v42 = vld [vmem:[#allocation7 + $0x58] sm:$0xff]   ;;  %v1419_v44 = vld [vmem:[#allocation7 + $0x60] sm:$0xff]   ;;  %p1531_p2 = pnand %p1530_p12, %p1524_p3 }
  0x75   : > { %1202 = vmatprep.subr.bf16.mxu0 %v1598_v0  ;;  %1222 = vmatprep.subr.bf16.mxu1 %v1598_v0  ;;  %v1418_v43 = vld [vmem:[#allocation7 + $0x18] sm:$0xff]   ;;  %v1420_v45 = vld [vmem:[#allocation7 + $0x20] sm:$0xff]   ;;  %v1421_v46 = vld [vmem:[#allocation7 + $0x68] sm:$0xff]  }
  0x76   : > { %v1422_v47 = vld [vmem:[#allocation7 + $0x28] sm:$0xff]   ;;  %v1423_v48 = vld [vmem:[#allocation7 + $0x70] sm:$0xff]   ;;  %v1425_v50 = vld [vmem:[#allocation7 + $0x78] sm:$0xff]  }
  0x77   : > { %v1424_v49 = vld [vmem:[#allocation7 + $0x30] sm:$0xff]   ;;  %v1426_v51 = vld [vmem:[#allocation7 + $0x38] sm:$0xff]   ;;  %v1427_v6 = vld [vmem:[#allocation7 + $0x80] sm:$0xff]  }
  0x78   : > { %1203 = vmatpush3.bf16.msra.mxu0 %v1393_v8  ;;  %1223 = vmatpush3.bf16.msra.mxu1 %v1394_v9  ;;  %v1100_v62 = vld [vmem:[%s1979_s2] ss:$0 sm:$0xff]  ;;  %v1428_v10 = vld [vmem:[#allocation7 + $0x88] sm:$0xff]   ;;  %v1434_v17 = vld [vmem:[#allocation7 + $0xb8] sm:$0xff]  }
  0x79   : > { %1204 = vmatprep.subr.bf16.mxu0 %v1598_v0  ;;  %1224 = vmatprep.subr.bf16.mxu1 %v1598_v0  ;;  %v1432_v14 = vld [vmem:[#allocation7 + $0xa8] sm:$0xff]  }
  0x7c   : > { %1205 = vmatpush3.bf16.msra.mxu0 %v1395_v11  ;;  %1225 = vmatpush3.bf16.msra.mxu1 %v1396_v12  ;;  %v1429_v11 = vld [vmem:[#allocation7 + $0x90] sm:$0xff]   ;;  %v1430_v12 = vld [vmem:[#allocation7 + $0x98] sm:$0xff]  }
  0x7d   : > { %1206 = vmatprep.subr.bf16.mxu0 %v1598_v0  ;;  %1226 = vmatprep.subr.bf16.mxu1 %v1598_v0 }
  0x80   : > { %1207 = vmatpush3.bf16.msra.mxu0 %v1397_v13  ;;  %1227 = vmatpush3.bf16.msra.mxu1 %v1398_v15  ;;  %v1431_v13 = vld [vmem:[#allocation7 + $0xa0] sm:$0xff]   ;;  %v1433_v15 = vld [vmem:[#allocation7 + $0xb0] sm:$0xff]  }
  0x81   : > { %1208 = vmatprep.subr.bf16.mxu0 %v1598_v0  ;;  %1228 = vmatprep.subr.bf16.mxu1 %v1598_v0 }
  0x84   : > { %1209 = vmatpush3.bf16.msra.mxu0 %v1399_v18  ;;  %1229 = vmatpush3.bf16.msra.mxu1 %v1400_v19 }
  0x85   : > { %1210 = vmatprep.subr.bf16.mxu0 %v1598_v0  ;;  %1230 = vmatprep.subr.bf16.mxu1 %v1598_v0 }
  0x88   : > { %1211 = vmatpush3.bf16.msra.mxu0 %v1401_v20  ;;  %1231 = vmatpush3.bf16.msra.mxu1 %v1402_v22 }
  0x89   : > { %1236 = vmatprep.subr.bf16.mxu0 %v1598_v0  ;;  %1256 = vmatprep.subr.bf16.mxu1 %v1598_v0 }
  0x8b   : > { %1213 = vmatmul.mubr.bf16.vlgmr.msra.gmra.mrb[0].mxu0 %v308_v24  ;;  %1233 = vmatmul.mubr.msk.bf16.vlgmr.msra.gmra.mrb[0].mxu1 %vm1084_vm2, %v1085_v25 }
  0x8c   : > { %1237 = vmatpush3.bf16.msra.mxu0 %v1403_v23  ;;  %1252 = vmatprep.mubr.msk.bf16.mxu0 %vm1599_vm0, %v1598_v0 }
  0x8d   : > { %1238 = vmatprep.subr.bf16.mxu0 %v1598_v0  ;;  %1272 = vmatprep.mubr.msk.bf16.mxu1 %vm1599_vm0, %v1598_v0 }
  0x8e   : > { %1257 = vmatpush3.bf16.msra.mxu1 %v1411_v36 }
  0x8f   : > { %1258 = vmatprep.subr.bf16.mxu1 %v1598_v0 }
  0x90   : > { %1239 = vmatpush3.bf16.msra.mxu0 %v1404_v26 }
  0x91   : > { %1240 = vmatprep.subr.bf16.mxu0 %v1598_v0 }
  0x92   : > { %1259 = vmatpush3.bf16.msra.mxu1 %v1413_v38 }
  0x93   : > { %1260 = vmatprep.subr.bf16.mxu1 %v1598_v0 }
  0x94   : > { %1241 = vmatpush3.bf16.msra.mxu0 %v1405_v27 }
  0x95   : > { %1242 = vmatprep.subr.bf16.mxu0 %v1598_v0 }
  0x96   : > { %1261 = vmatpush3.bf16.msra.mxu1 %v1415_v40 }
  0x97   : > { %1262 = vmatprep.subr.bf16.mxu1 %v1598_v0 }
  0x98   : > { %1243 = vmatpush3.bf16.msra.mxu0 %v1406_v28 }
  0x99   : > { %1244 = vmatprep.subr.bf16.mxu0 %v1598_v0 }
  0x9a   : > { %1263 = vmatpush3.bf16.msra.mxu1 %v1417_v42 }
  0x9b   : > { %1264 = vmatprep.subr.bf16.mxu1 %v1598_v0 }
  0x9c   : > { %1245 = vmatpush3.bf16.msra.mxu0 %v1407_v29  ;;  %v1135_v29 = vld [vmem:[%s1981_s4] ss:$0 sm:$0xff] }
  0x9d   : > { %1246 = vmatprep.subr.bf16.mxu0 %v1598_v0 }
  0x9e   : > { %1265 = vmatpush3.bf16.msra.mxu1 %v1419_v44 }
  0x9f   : > { %1266 = vmatprep.subr.bf16.mxu1 %v1598_v0 }
  0xa0   : > { %1247 = vmatpush3.bf16.msra.mxu0 %v1408_v30 }
  0xa1   : > { %1248 = vmatprep.subr.bf16.mxu0 %v1598_v0 }
  0xa2   : > { %1267 = vmatpush3.bf16.msra.mxu1 %v1421_v46 }
  0xa3   : > { %1268 = vmatprep.subr.bf16.mxu1 %v1598_v0 }
  0xa4   : > { %1249 = vmatpush3.bf16.msra.mxu0 %v1409_v31 }
  0xa5   : > { %1250 = vmatprep.subr.bf16.mxu0 %v1598_v0 }
  0xa6   : > { %1269 = vmatpush3.bf16.msra.mxu1 %v1423_v48 }
  0xa7   : > { %1270 = vmatprep.subr.bf16.mxu1 %v1598_v0 }
  0xa8   : > { %1251 = vmatpush3.bf16.msra.mxu0 %v1410_v33 }
  0xa9   : > { %1276 = vmatprep.subr.bf16.mxu0 %v1598_v0 }
  0xaa   : > { %1271 = vmatpush3.bf16.msra.mxu1 %v1425_v50 }
  0xab   : > { %1253 = vmatmul.mubr.msk.bf16.vlgmr.msra.gmra.mrb[4].mxu0 %vm1097_vm4, %v1098_v35  ;;  %1296 = vmatprep.subr.bf16.mxu1 %v1598_v0 }
  0xac   : > { %1292 = vmatprep.mubr.msk.bf16.mxu0 %vm1599_vm0, %v1598_v0  ;;  %1277 = vmatpush3.bf16.msra.mxu0 %v1412_v37 }
  0xad   : > { %1278 = vmatprep.subr.bf16.mxu0 %v1598_v0 }
  0xb0   : > { %1279 = vmatpush3.bf16.msra.mxu0 %v1414_v39 }
  0xb1   : > { %1280 = vmatprep.subr.bf16.mxu0 %v1598_v0 }
  0xb4   : > { %1281 = vmatpush3.bf16.msra.mxu0 %v1416_v41 }
  0xb5   : > { %1282 = vmatprep.subr.bf16.mxu0 %v1598_v0 }
  0xb8   : > { %1283 = vmatpush3.bf16.msra.mxu0 %v1418_v43 }
  0xb9   : > { %1284 = vmatprep.subr.bf16.mxu0 %v1598_v0 }
  0xbc   : > { %1285 = vmatpush3.bf16.msra.mxu0 %v1420_v45 }
  0xbd   : > { %1286 = vmatprep.subr.bf16.mxu0 %v1598_v0 }
  0xc0   : > { %1287 = vmatpush3.bf16.msra.mxu0 %v1422_v47 }
  0xc1   : > { %1288 = vmatprep.subr.bf16.mxu0 %v1598_v0 }
  0xc4   : > { %1289 = vmatpush3.bf16.msra.mxu0 %v1424_v49 }
  0xc5   : > { %1290 = vmatprep.subr.bf16.mxu0 %v1598_v0 }
  0xc8   : > { %1291 = vmatpush3.bf16.msra.mxu0 %v1426_v51 }
 0x15e   : > { %v408_v52 = vpop.f32.mrb[0].mxu0  ;;  %v496_v54 = vpop.f32.mrb[0].mxu1 }
 0x15f   : > { %v1214_v53 = vpop.f32.mrb[1].mxu0  ;;  %v497_v55 = vadd.f32 %v496_v54, %v408_v52  ;;  %v1234_v57 = vpop.f32.mrb[1].mxu1 }
 0x160   : > { %v411_v56 = vpop.f32.mrb[2].mxu0  ;;  %v499_v59 = vpop.f32.mrb[2].mxu1 }
 0x161   : > { %v1215_v58 = vpop.f32.mrb[3].mxu0  ;;  %v1235_v60 = vpop.f32.mrb[3].mxu1 }
 0x17e   : > { %v602_v61 = vpop.f32.mrb[4].mxu0 }
 0x17f   : > { %v608_v63 = vadd.f32 %v602_v61, %v497_v55  ;;  %v1254_v1 = vpop.f32.mrb[5].mxu0 }
 0x180   : > { %v605_v2 = vpop.f32.mrb[6].mxu0 }
 0x181   : > { %v616_v3 = vadd.f32 %v1100_v62, %v608_v63  ;;  %v1255_v4 = vpop.f32.mrb[7].mxu0 }
 0x183   : > { %v617_v5 = vmax.f32 %v616_v3, 0.0 }
 0x185   : > { %v618_v7 = vrot.slane %v617_v5, 7  ;;  %v639_v8 = vpack.c.bf16 %v617_v5, %v617_v5  ;;  %v620_v18 = vrot.slane %v617_v5, 1 }
 0x187   : > { %v1120_v9 = vpack.c.bf16 %v618_v7, %v618_v7  ;;  %1273 = vmatmul.mubr.bf16.vlgmr.msra.gmra.mrb[4].mxu1 %v639_v8  ;;  %v1133_v19 = vpack.c.bf16 %v620_v18, %v620_v18 }
 0x188   : > { %1297 = vmatpush3.bf16.msra.mxu1 %v1427_v6  ;;  %1312 = vmatprep.mubr.msk.bf16.mxu1 %vm1599_vm0, %v1598_v0 }
 0x189   : > { %1293 = vmatmul.mubr.msk.bf16.vlgmr.msra.gmra.mrb[8].mxu0 %vm1084_vm2, %v1120_v9  ;;  %1298 = vmatprep.subr.bf16.mxu1 %v1598_v0 }
 0x18c   : > { %1299 = vmatpush3.bf16.msra.mxu1 %v1428_v10 }
 0x18d   : > { %1300 = vmatprep.subr.bf16.mxu1 %v1598_v0 }
 0x190   : > { %1301 = vmatpush3.bf16.msra.mxu1 %v1429_v11 }
 0x191   : > { %1302 = vmatprep.subr.bf16.mxu1 %v1598_v0 }
 0x194   : > { %1303 = vmatpush3.bf16.msra.mxu1 %v1430_v12 }
 0x195   : > { %1304 = vmatprep.subr.bf16.mxu1 %v1598_v0 }
 0x198   : > { %1305 = vmatpush3.bf16.msra.mxu1 %v1431_v13 }
 0x199   : > { %1306 = vmatprep.subr.bf16.mxu1 %v1598_v0 }
 0x19c   : > { %1307 = vmatpush3.bf16.msra.mxu1 %v1432_v14 }
 0x19d   : > { %1308 = vmatprep.subr.bf16.mxu1 %v1598_v0 }
 0x1a0   : > { %1309 = vmatpush3.bf16.msra.mxu1 %v1433_v15 }
 0x1a1   : > { %1310 = vmatprep.subr.bf16.mxu1 %v1598_v0 }
 0x1a4   : > { %1311 = vmatpush3.bf16.msra.mxu1 %v1434_v17 }
 0x1a7   : > { %1313 = vmatmul.mubr.msk.bf16.vlgmr.msra.gmra.mrb[8].mxu1 %vm1097_vm4, %v1133_v19 }
 0x25a   : > { %v739_v20 = vpop.f32.mrb[4].mxu1 }
 0x25b   : > { %v1274_v21 = vpop.f32.mrb[5].mxu1 }
 0x25c   : > { %v742_v22 = vpop.f32.mrb[6].mxu1  ;;  %v827_v23 = vpop.f32.mrb[8].mxu0 }
 0x25d   : > { %v828_v24 = vadd.f32 %v827_v23, %v739_v20  ;;  %v1275_v25 = vpop.f32.mrb[7].mxu1  ;;  %v1294_v26 = vpop.f32.mrb[9].mxu0 }
 0x25e   : > { %v830_v27 = vpop.f32.mrb[10].mxu0 }
 0x25f   : > { %v1295_v28 = vpop.f32.mrb[11].mxu0 }
 0x27a   : > { %v933_v0 = vpop.f32.mrb[8].mxu1 }
 0x27b   : > { %v939_v30 = vadd.f32 %v933_v0, %v828_v24  ;;  %v1314_v31 = vpop.f32.mrb[9].mxu1 }
 0x27c   : > { %v936_v32 = vpop.f32.mrb[10].mxu1 }
 0x27d   : > { %v947_v33 = vadd.f32 %v1135_v29, %v939_v30  ;;  %v1315_v34 = vpop.f32.mrb[11].mxu1 }
 0x27f   : > { %v948_v35 = vadd.f32 %v947_v33, %v1836_v16 }
 0x281   : > { %v949_v36 = vmax.f32 %v948_v35, 0.0 }
 0x283   : > { %950 = vst [vmem:[%s268_s28] sm:$0xff] %v949_v36 }
 0x284   : > { %1534 = shalt.err (!%p1531_p2)
}
 0x285   : > { %s1535_s12 = scalar_lea.hbm %s1933_s15, 128  ;;  %s1539_s26 = scalar_lea.hbm %s1982_s5, 256 }
 0x286   : > { %p1536_p13 = scmp.ne.s32.totalorder %s1933_s15, %s1535_s12  ;;  %p1540_p4 = scmp.lt.u32.totalorder %s1933_s15, %s1982_s5 }
 0x287   : > { %p1541_p5 = scmp.lt.u32.totalorder %s1539_s26, %s1535_s12  ;;  %p1543_p11 = scmp.lt.u32.totalorder %s1535_s12, %s1933_s15 }
 0x288   : > { %p1537_p6 = pnand %p1536_p13, %p2000_p0 }
 0x289   : > { %p1542_p8 = por %p1541_p5, %p1540_p4 }
 0x28a   : > { %p1538_p10 = pneg %p1537_p6 }
 0x28b   : > { %p1544_p1 = por %p1543_p11, %p1542_p8 }
 0x28d   : > { %p1545_p3 = pnand %p1544_p1, %p1538_p10 }
 0x28f   : > { %1548 = shalt.err (!%p1545_p3)
}
 0x290   : > { %1326 = dma.vmem_to_hbm [thread:$0]  (%p2000_p0), %s1935_s7, 128, %s1933_s15, %s952_s16  }
 0x291 PF: > { %s977_s11 = sand.u32 1, %s1579_s18   ;;  %p2001_p7 = scmp.ne.s32.totalorder %s1987_s25, 0 }
 0x292   : > { %p2002_p9 = scmp.ge.s32.totalorder %s1591_s21, 2  ;;  %s978_s28 = scalar_lea.sflag [#allocation4], %s977_s11 }
 0x294   : > { %p1340_p12 = pnand %p2002_p9, %p2001_p7 }
 0x296   : > { %1574 = dma.done.wait (!%p1340_p12), %s978_s28, 128  }
 0x297   : > { %1576 = vsyncadd (!%p1340_p12), %s978_s28, 4294967168  ;;  %p19_p2 = scmp.ge.s32.totalorder %s1741_s14, 4   ;;  %s2003_s18 = smov %s1583_s19 }
 0x298   : > { %s2004_s19 = smov %s1587_s20  ;;  %s2005_s20 = smov %s1757_s27 }
 0x299   : > { %s2006_s21 = smov %s1741_s14  ;;  %21 = sbr.rel (!%p19_p2) target bundleno = 6 (0x6), region = 97 }
 0x2a0   :  { %983 = vsyncpa [#allocation3], 1 }
 0x2a1   :  { %985 = vsyncpa [#allocation3 + $0x1], 1 }
 0x2a2   :  { %986 = vsyncpa [#allocation6], 1 }
 0x2a3   :  { %987 = vsyncpa [#allocation4], 1 }
 0x2a4   :  { %989 = vsyncpa [#allocation4 + $0x1], 1 }

</bundles_post_ra>
